<compile_context>
chip_gen: v7x
topology: tpu7x:2x2x1
jax: 0.10.0
libtpu: 0.0.40
codegen_flags: <defaults>
</compile_context>

<pallas_src>
import functools

import jax
import jax.numpy as jnp
from jax.experimental import pallas as pl
from jax.experimental.pallas import tpu as pltpu


def _round_up(x, m):
    return ((x + m - 1) // m) * m


def _focal_loss_kernel(x_ref, t_ref, out_ref, *, gamma, ignore_index, hw,
                       tile_hw, ragged, exp_in_bf16):
    i = pl.program_id(1)

    x = x_ref[...].astype(jnp.float32)          # (C, T): classes on sublanes, pixels on lanes
    t = t_ref[...]                              # (1, T) int32

    # Numerically-stable log-sum-exp over the class (sublane) axis.
    m = jnp.max(x, axis=0, keepdims=True)                                   # (1, T)
    xm = x - m
    if exp_in_bf16:
        # v6e/v7x only (bf16 EUP): ~2x exp throughput; class sum stays f32.
        e = jnp.exp(xm.astype(jnp.bfloat16)).astype(jnp.float32)
    else:
        e = jnp.exp(xm)
    lse = m + jnp.log(jnp.sum(e, axis=0, keepdims=True))                    # (1, T)

    # Target-class logit via a one-hot compare (no dynamic gather on TPU).
    cls = jax.lax.broadcasted_iota(jnp.int32, x.shape, 0)                   # (C, T)
    tgt_logit = jnp.sum(jnp.where(cls == t, x, 0.0), axis=0, keepdims=True)  # (1, T)

    # Validity: drop ignore_index pixels; for a ragged last tile also drop
    # lanes past the true pixel count (static specialization: aligned HW skips
    # the iota/compare entirely).  NOTE: labels outside [0, C) that are not
    # ignore_index give ce = lse; add `t < C` here if labels are not clean.
    valid = t != ignore_index
    if ragged:
        lane = jax.lax.broadcasted_iota(jnp.int32, t.shape, 1)
        valid = jnp.logical_and(valid, (i * tile_hw + lane) < hw)

    # where-SELECT (not multiply) so garbage out-of-bounds lanes cannot
    # propagate NaN/Inf into the sum.
    ce = jnp.maximum(jnp.where(valid, lse - tgt_logit, 0.0), 0.0)           # (1, T)

    # Focal weighting; gamma is static, so specialize at trace time.  alpha and
    # the mean divide are applied in the final JAX scalar math (hoisted).
    if gamma == 0.0:
        fl = ce
    else:
        pt = jnp.exp(-ce)
        base = 1.0 - pt                      # >= 0 because ce >= 0
        if float(gamma).is_integer() and 1.0 <= gamma <= 8.0:
            w = base
            for _ in range(int(gamma) - 1):
                w = w * base
        else:
            w = jnp.power(base, gamma)
        fl = w * ce

    # One cross-lane reduce per tile (cheap vs. the block DMA); broadcast the
    # scalar into a full (8,128) output block so the out BlockSpec stays
    # tiling-conforming.  JAX reads back element [0, 0] of each block.
    s = jnp.sum(fl)
    out_ref[...] = jnp.broadcast_to(s, out_ref.shape)


def focal_loss(logits_nchw, targets_nhw, *, alpha=1.0, gamma=0.0,
               ignore_index=255, size_average=True, tile_hw=65536,
               feed_dtype=None, exp_in_bf16=False):
    N, C, H, W = logits_nchw.shape
    HW = H * W

    # No transpose / pad copies in HBM: contiguous reshapes only.
    x = logits_nchw.reshape(N, C, HW)
    if feed_dtype is not None:
        x = x.astype(feed_dtype)        # e.g. bf16: halves the dominant HBM stream
    t = targets_nhw.reshape(N, 1, HW).astype(jnp.int32)
    # TODO(synk): feeding uint8 targets would trim another few % of HBM bytes.

    x_bytes = jnp.dtype(x.dtype).itemsize

    # VMEM-aware tile sizing: double-buffered input blocks plus in-kernel f32
    # temporaries must fit comfortably (v7x only has 64 MiB of VMEM; v5e/v6e
    # have 128 MiB).  Fall back to a conservative 64 MiB if the query fails.
    try:
        vmem_cap = int(pltpu.get_tpu_info().vmem_capacity_bytes)
    except Exception:
        vmem_cap = 64 * 1024 * 1024
    vmem_limit = int(min((vmem_cap * 3) // 4, 100 * 1024 * 1024))
    # Rough bytes/pixel: 2 pipeline buffers of (logits + targets) + f32 temps
    # (upcast logits, exp(x-m), and a handful of (1, T) vectors).
    per_pixel = 2 * (C * x_bytes + 4) + 4 * (2 * C + 8)
    tile_cap = max(128, ((vmem_limit // 2) // per_pixel) // 128 * 128)

    # Lane-dense pixel tile (multiple of 128); ragged tail handled in-kernel.
    tile = int(min(int(tile_hw), int(tile_cap), _round_up(HW, 128)))
    tile = max(128, (tile // 128) * 128)
    n_tiles = pl.cdiv(HW, tile)
    ragged = (HW % tile) != 0

    kernel = functools.partial(
        _focal_loss_kernel, gamma=float(gamma), ignore_index=int(ignore_index),
        hw=int(HW), tile_hw=int(tile), ragged=bool(ragged),
        exp_in_bf16=bool(exp_in_bf16))

    # Only when the tile is forced small (tiny images, many tiles): a third
    # buffer hides the per-strip issue latency of the strided logits block.
    if n_tiles > 2 and tile <= 4096:
        x_spec = pl.BlockSpec((None, C, tile), lambda n, i: (n, 0, i),
                              pipeline_mode=pl.Buffered(3))
    else:
        x_spec = pl.BlockSpec((None, C, tile), lambda n, i: (n, 0, i))

    partials = pl.pallas_call(
        kernel,
        out_shape=jax.ShapeDtypeStruct((N, n_tiles, 8, 128), jnp.float32),
        grid_spec=pltpu.PrefetchScalarGridSpec(
            num_scalar_prefetch=0,
            grid=(N, n_tiles),
            in_specs=[
                x_spec,
                pl.BlockSpec((None, 1, tile), lambda n, i: (n, 0, i)),
            ],
            out_specs=pl.BlockSpec((None, 1, 8, 128),
                                   lambda n, i: (n, i, 0, 0)),
        ),
        compiler_params=pltpu.CompilerParams(
            dimension_semantics=("parallel", "parallel"),
            vmem_limit_bytes=vmem_limit),
    )(x, t)

    # Final reduction + alpha + mean divide in JAX (tiny (N, n_tiles) slab).
    total = jnp.float32(alpha) * jnp.sum(partials[:, :, 0, 0])
    if size_average:
        # torch .mean() divides by ALL pixels (ignored ones contribute 0).
        return total / jnp.float32(N * HW)
    return total


if __name__ == "__main__":
    key = jax.random.PRNGKey(0)
    k_logits, k_targets, k_mask = jax.random.split(key, 3)

    def reference(logits, targets, alpha, gamma, ignore_index, size_average):
        n, c, h, w = logits.shape
        xr = jnp.transpose(logits, (0, 2, 3, 1)).reshape(-1, c).astype(jnp.float32)
        tr = targets.reshape(-1)
        lse = jax.scipy.special.logsumexp(xr, axis=-1)
        valid = tr != ignore_index
        tsafe = jnp.where(valid, tr, 0)
        tgt = jnp.take_along_axis(xr, tsafe[:, None], axis=-1)[:, 0]
        ce = jnp.where(valid, lse - tgt, 0.0)
        pt = jnp.exp(-ce)
        fl = alpha * (1.0 - pt) ** gamma * ce
        return fl.mean() if size_average else fl.sum()

    # Case 1: tile-aligned pixel count, gamma=0 (the trainer's default config).
    N, C, H, W = 2, 4, 16, 16
    logits = jax.random.normal(k_logits, (N, C, H, W), dtype=jnp.float32)
    targets = jax.random.randint(k_targets, (N, H, W), 0, C, dtype=jnp.int32)
    ignore_mask = jax.random.bernoulli(k_mask, 0.1, (N, H, W))
    targets = jnp.where(ignore_mask, jnp.int32(255), targets)

    loss = focal_loss(logits, targets, alpha=1.0, gamma=0.0,
                      ignore_index=255, size_average=True)
    jax.block_until_ready(loss)
    ref = reference(logits, targets, 1.0, 0.0, 255, True)
    assert jnp.allclose(loss, ref, rtol=1e-4, atol=1e-5), (loss, ref)

    # Case 2: ragged pixel count (H*W not a multiple of 128), integer gamma, sum.
    H2, W2 = 17, 17
    logits2 = jax.random.normal(k_logits, (N, C, H2, W2), dtype=jnp.float32)
    targets2 = jax.random.randint(k_targets, (N, H2, W2), 0, C, dtype=jnp.int32)
    ignore_mask2 = jax.random.bernoulli(k_mask, 0.1, (N, H2, W2))
    targets2 = jnp.where(ignore_mask2, jnp.int32(255), targets2)

    loss2 = focal_loss(logits2, targets2, alpha=0.5, gamma=2.0,
                       ignore_index=255, size_average=False)
    jax.block_until_ready(loss2)
    ref2 = reference(logits2, targets2, 0.5, 2.0, 255, False)
    assert jnp.allclose(loss2, ref2, rtol=1e-4, atol=1e-4), (loss2, ref2)

    # Case 3: multiple pixel tiles (per-tile partial outputs, ragged last tile)
    # with a bf16 logits feed; reference uses the same bf16-rounded logits.
    H3, W3 = 30, 30
    logits3 = jax.random.normal(k_logits, (N, C, H3, W3), dtype=jnp.float32)
    targets3 = jax.random.randint(k_targets, (N, H3, W3), 0, C, dtype=jnp.int32)
    ignore_mask3 = jax.random.bernoulli(k_mask, 0.1, (N, H3, W3))
    targets3 = jnp.where(ignore_mask3, jnp.int32(255), targets3)

    loss3 = focal_loss(logits3, targets3, alpha=0.25, gamma=2.0,
                       ignore_index=255, size_average=True,
                       tile_hw=512, feed_dtype=jnp.bfloat16)
    jax.block_until_ready(loss3)
    logits3_bf16 = logits3.astype(jnp.bfloat16).astype(jnp.float32)
    ref3 = reference(logits3_bf16, targets3, 0.25, 2.0, 255, True)
    assert jnp.allclose(loss3, ref3, rtol=1e-4, atol=1e-4), (loss3, ref3)

    print("KERNEL_OK")
</pallas_src>

<mosaic_0001>
module attributes {stable_mosaic.version = 11 : i64} {
  func.func @_focal_loss_kernel(%arg0: i32, %arg1: i32, %arg2: memref<1x4x256xf32, #tpu.memory_space<vmem>>, %arg3: memref<1x1x256xi32, #tpu.memory_space<vmem>>, %arg4: memref<1x1x8x128xf32, #tpu.memory_space<vmem>>) attributes {dimension_semantics = [#tpu.dimension_semantics<parallel>, #tpu.dimension_semantics<parallel>], iteration_bounds = array<i64: 2, 1>, scalar_prefetch = 0 : i64, scratch_operands = 0 : i64, tpu.core_type = #tpu.core_type<tc>, window_params = [{transform_indices = @transform_0, window_bounds = array<i64: 1, 4, 256>}, {transform_indices = @transform_1, window_bounds = array<i64: 1, 1, 256>}, {transform_indices = @transform_2, window_bounds = array<i64: 1, 1, 8, 128>}]} {
    %c0 = arith.constant 0 : index
    %c0_0 = arith.constant 0 : index
    %c0_1 = arith.constant 0 : index
    %0 = vector.load %arg2[%c0, %c0_0, %c0_1] : memref<1x4x256xf32, #tpu.memory_space<vmem>>, vector<1x4x256xf32>
    %1 = vector.shape_cast %0 : vector<1x4x256xf32> to vector<4x256xf32>
    %c0_2 = arith.constant 0 : index
    %c0_3 = arith.constant 0 : index
    %c0_4 = arith.constant 0 : index
    %2 = vector.load %arg3[%c0_2, %c0_3, %c0_4] : memref<1x1x256xi32, #tpu.memory_space<vmem>>, vector<1x1x256xi32>
    %3 = vector.shape_cast %2 : vector<1x1x256xi32> to vector<1x256xi32>
    %cst = arith.constant dense<0xFF800000> : vector<256xf32>
    %4 = vector.multi_reduction <maximumf>, %1, %cst [0] : vector<4x256xf32> to vector<256xf32>
    %5 = vector.shape_cast %4 : vector<256xf32> to vector<1x256xf32>
    %6 = vector.broadcast %5 : vector<1x256xf32> to vector<4x256xf32>
    %7 = arith.subf %1, %6 : vector<4x256xf32>
    %8 = math.exp %7 : vector<4x256xf32>
    %cst_5 = arith.constant dense<0.000000e+00> : vector<256xf32>
    %9 = vector.multi_reduction <add>, %8, %cst_5 [0] : vector<4x256xf32> to vector<256xf32>
    %10 = vector.shape_cast %9 : vector<256xf32> to vector<1x256xf32>
    %11 = math.log %10 : vector<1x256xf32>
    %12 = arith.addf %5, %11 : vector<1x256xf32>
    %13 = tpu.iota {dimensions = array<i32: 0>} : vector<4x256xi32>
    %14 = vector.broadcast %3 : vector<1x256xi32> to vector<4x256xi32>
    %15 = arith.cmpi eq, %13, %14 : vector<4x256xi32>
    %cst_6 = arith.constant 0.000000e+00 : f32
    %16 = vector.broadcast %cst_6 : f32 to vector<4x256xf32>
    %17 = arith.select %15, %1, %16 : vector<4x256xi1>, vector<4x256xf32>
    %cst_7 = arith.constant dense<0.000000e+00> : vector<256xf32>
    %18 = vector.multi_reduction <add>, %17, %cst_7 [0] : vector<4x256xf32> to vector<256xf32>
    %19 = vector.shape_cast %18 : vector<256xf32> to vector<1x256xf32>
    %c255_i32 = arith.constant 255 : i32
    %20 = vector.broadcast %c255_i32 : i32 to vector<1x256xi32>
    %21 = arith.cmpi ne, %3, %20 : vector<1x256xi32>
    %22 = arith.subf %12, %19 : vector<1x256xf32>
    %cst_8 = arith.constant 0.000000e+00 : f32
    %23 = vector.broadcast %cst_8 : f32 to vector<1x256xf32>
    %24 = arith.select %21, %22, %23 : vector<1x256xi1>, vector<1x256xf32>
    %cst_9 = arith.constant 0.000000e+00 : f32
    %25 = vector.broadcast %cst_9 : f32 to vector<1x256xf32>
    %26 = arith.maximumf %24, %25 : vector<1x256xf32>
    %27 = vector.shape_cast %26 : vector<1x256xf32> to vector<1x1x256xf32>
    %cst_10 = arith.constant dense<0.000000e+00> : vector<1xf32>
    %28 = vector.multi_reduction <add>, %27, %cst_10 [1, 2] : vector<1x1x256xf32> to vector<1xf32>
    %29 = vector.shape_cast %28 : vector<1xf32> to vector<1x1x1xf32>
    %30 = vector.extract %29[0, 0, 0] : f32 from vector<1x1x1xf32>
    %31 = vector.broadcast %30 : f32 to vector<1x8x128xf32>
    %c0_11 = arith.constant 0 : index
    %c0_12 = arith.constant 0 : index
    %c0_13 = arith.constant 0 : index
    %c0_14 = arith.constant 0 : index
    %32 = vector.load %arg4[%c0_11, %c0_12, %c0_13, %c0_14] : memref<1x1x8x128xf32, #tpu.memory_space<vmem>>, vector<1x1x8x128xf32>
    %33 = vector.shape_cast %32 : vector<1x1x8x128xf32> to vector<1x8x128xf32>
    %34 = vector.shape_cast %31 : vector<1x8x128xf32> to vector<1x1x8x128xf32>
    tpu.vector_store %arg4[%c0_11, %c0_12, %c0_13, %c0_14], %34 {strides = array<i32>} : memref<1x1x8x128xf32, #tpu.memory_space<vmem>>, vector<1x1x8x128xf32>,
    return
  }
  func.func @transform_0(%arg0: i32, %arg1: i32) -> (i32, i32, i32) {
    %c0_i32 = arith.constant 0 : i32
    %c0_i32_0 = arith.constant 0 : i32
    return %arg0, %c0_i32, %arg1 : i32, i32, i32
  }
  func.func @transform_1(%arg0: i32, %arg1: i32) -> (i32, i32, i32) {
    %c0_i32 = arith.constant 0 : i32
    %c0_i32_0 = arith.constant 0 : i32
    return %arg0, %c0_i32, %arg1 : i32, i32, i32
  }
  func.func @transform_2(%arg0: i32, %arg1: i32) -> (i32, i32, i32, i32) {
    %c0_i32 = arith.constant 0 : i32
    %c0_i32_0 = arith.constant 0 : i32
    %c0_i32_1 = arith.constant 0 : i32
    return %arg0, %arg1, %c0_i32, %c0_i32_0 : i32, i32, i32, i32
  }
}

</mosaic_0001>

<bundles_post_ra>
// kernel: tpu_custom_call.1
= control target key start
LH: loop header
LB: loop body
LE: loop exit
PB: predicated region body
PF: predicated region fallthrough
CT: control target
= control target key end

     0   :  { %7 = vsyncpa [#allocation3], 0  ;;  %s968_s0 = inlined_call_operand.hbm [shape: f32[2,4,256], index: 0, kind: input, shape index: {}]   ;;  %s969_s1 = inlined_call_operand.hbm [shape: s32[2,1,256], index: 1, kind: input, shape index: {}]   ;;  %s970_s2 = inlined_call_operand.hbm [shape: f32[2,1,8,128], index: 2, kind: output, shape index: {}]  }
   0x1   :  { %9 = vsyncpa [#allocation3 + $0x1], 0 }
   0x2   :  { %10 = vsyncpa [#allocation6], 0 }
   0x3   :  { %12 = vsyncpa [#allocation6 + $0x1], 0 }
   0x4   :  { %13 = vsyncpa [#allocation4], 0 }
   0x5   :  { %15 = vsyncpa [#allocation4 + $0x1], 0  ;;  %s736_s9 = smov 0   ;;  %s738_s10 = smov 0  }
   0x6   :  { %s740_s11 = smov 0   ;;  %s742_s12 = smov 0  }
   0x7   :  { %s744_s13 = smov 0   ;;  %s746_s14 = smov 0  }
   0x8 LB: > { %s472_s15 = sadd.s32 4294967295, %s715_s14   ;;  %s473_s16 = sadd.s32 4294967294, %s715_s14   ;;  %s715_s14 = sphi %s746_s14, %s21_s14   ;;  %s711_s13 = sphi %s744_s13, %s990_s13   ;;  %s707_s12 = sphi %s742_s12, %s989_s12   ;;  %s703_s11 = sphi %s740_s11, %s988_s11   ;;  %s699_s10 = sphi %s738_s10, %s987_s10   ;;  %s695_s9 = sphi %s736_s9, %s986_s9  }
   0x9   : > { %s33_s17 = sadd.s32 1, %s711_s13  ;;  %s42_s18 = sadd.s32 1, %s703_s11 }
   0xa   : > { %p35_p0 = scmp.ge.s32.totalorder %s33_s17, 2  ;;  %p49_p1 = scmp.ne.s32.totalorder %s703_s11, %s699_s10 }
   0xb   : > { %p50_p2 = scmp.eq.s32.totalorder %s715_s14, 0  ;;  %p55_p3 = scmp.ne.s32.totalorder %s699_s10, %s695_s9 }
   0xc   : > { %s992_s17 = smov (%p35_p0, %s33_s17), 0  ;;  %p56_p5 = scmp.eq.s32.totalorder %s472_s15, 0 }
   0xd   : > { %p777_p4 = por %p50_p2, %p49_p1  ;;  %s37_s20 = ssub.s32 %s711_s13, %s992_s17 }
   0xe   : > { %p109_p6 = scmp.eq.s32.totalorder %s472_s15, 1  ;;  %p40_p7 = scmp.eq.s32.totalorder %s37_s20, 0 }
   0xf   : > { %p783_p8 = por %p56_p5, %p55_p3  ;;  %p115_p10 = scmp.eq.s32.totalorder %s473_s16, 1 }
  0x10   : > { %p787_p9 = por %p109_p6, %p49_p1  ;;  %p511_p13 = scmp.lt.s32.totalorder %s715_s14, 2 }
  0x11   : > { %s974_s21 = scalar_select %p783_p8, 1, 0 }
  0x12   : > { %s975_s22 = scalar_select %p787_p9, 1, 0 }
  0x13   : > { %s792_s23 = scalar_select %p40_p7, %s703_s11, %s42_s18  }
  0x14   : > { %p794_p11 = por %p115_p10, %p55_p3  ;;  %s801_s25 = sand.u32 1, %s703_s11  }
  0x15   : > { %s476_s26 = sshll.u32 %s801_s25, 3  ;;  %s490_s27 = sshll.u32 %s711_s13, 7 }
  0x16   : > { %s976_s24 = scalar_select %p794_p11, 1, 0 }
  0x17   : > { %s808_s30 = scalar_lea.hbm %s968_s0, %s490_s27  ;;  %s139_s3 = scalar_lea.vmem [#allocation2], %s476_s26 }
  0x18   : > { %s149_s4 = sshll.u32 %s139_s3, 4  ;;  %p814_p0 = pnand %p511_p13, %p777_p4  ;;  %s810_s4 = int_to_ptr.vmem [resolvable:$true] %s149_s4 }
  0x19   : > { %s136_s6 = scalar_lea.sflag [#allocation3], %s801_s25  ;;  %s569_s7 = scalar_lea.hbm %s808_s30, 128 }
  0x1a   : > { %p570_p3 = scmp.ne.s32.totalorder %s808_s30, %s569_s7  ;;  %p571_p5 = pneg %p814_p0 }
  0x1b   : > { %s574_s16 = scalar_lea.hbm %s968_s0, 256  ;;  %p575_p4 = scmp.lt.u32.totalorder %s808_s30, %s968_s0 }
  0x1c   : > { %p572_p6 = pnand %p571_p5, %p570_p3  ;;  %p576_p10 = scmp.lt.u32.totalorder %s574_s16, %s569_s7 }
  0x1d   : > { %p578_p12 = scmp.lt.u32.totalorder %s569_s7, %s808_s30 }
  0x1e   : > { %p573_p7 = pneg %p572_p6  ;;  %p577_p13 = por %p576_p10, %p575_p4 }
  0x20   : > { %p579_p1 = por %p578_p12, %p577_p13 }
  0x22   : > { %p580_p2 = pnand %p579_p1, %p573_p7 }
  0x24   : > { %583 = shalt.err (!%p580_p2)
}
  0x25   : > { %s584_s20 = scalar_lea.vmem %s810_s4, 128  ;;  %s717_s26 = smov [#allocation2]  }
  0x26   : > { %p585_p3 = scmp.ne.s32.totalorder %s810_s4, %s584_s20  ;;  %s589_s27 = sshll.u32 %s717_s26, 4  ;;  %s590_s27 = int_to_ptr.vmem [resolvable:$false] %s589_s27 }
  0x27   : > { %s591_s28 = scalar_lea.vmem %s590_s27, 256  ;;  %p592_p9 = scmp.lt.s32.totalorder %s810_s4, %s590_s27 }
  0x28   : > { %p587_p6 = pnand %p585_p3, %p571_p5  ;;  %p593_p4 = scmp.lt.s32.totalorder %s591_s28, %s584_s20 }
  0x2a   : > { %p588_p11 = pneg %p587_p6  ;;  %p594_p10 = por %p593_p4, %p592_p9 }
  0x2c   : > { %p595_p12 = pnand %p594_p10, %p588_p11 }
  0x2e   : > { %598 = shalt.err (!%p595_p12)
}
  0x2f   : > { %503 = dma.hbm_to_vmem [thread:$0]  (!%p814_p0), %s808_s30, 128, %s810_s4, %s136_s6  }
  0x30   : > { %p978_p1 = scmp.lt.s32.totalorder %s715_s14, 3  ;;  %p979_p2 = scmp.ge.s32.totalorder %s715_s14, 1 }
  0x31   : > { %s479_s3 = sshll.u32 %s801_s25, 1  ;;  %s491_s7 = sshll.u32 %s711_s13, 5 }
  0x32   : > { %p850_p7 = pnand %p979_p2, %p978_p1  ;;  %s859_s16 = scalar_lea.hbm %s969_s1, %s491_s7 }
  0x33   : > { %s160_s18 = scalar_lea.vmem [#allocation5], %s479_s3  ;;  %s157_s30 = scalar_lea.sflag [#allocation6], %s801_s25 }
  0x34   : > { %s980_s29 = scalar_select %p850_p7, 1, 0 }
  0x35   : > { %s170_s19 = sshll.u32 %s160_s18, 4  ;;  %s599_s4 = scalar_lea.hbm %s859_s16, 32  ;;  %s171_s19 = int_to_ptr.vmem [resolvable:$true] %s170_s19 }
  0x36   : > { %p600_p9 = scmp.ne.s32.totalorder %s859_s16, %s599_s4  ;;  %s604_s26 = scalar_lea.hbm %s969_s1, 64 }
  0x37   : > { %p605_p3 = scmp.lt.u32.totalorder %s859_s16, %s969_s1  ;;  %p606_p6 = scmp.lt.u32.totalorder %s604_s26, %s599_s4 }
  0x38   : > { %p602_p11 = pnand %p600_p9, %p571_p5  ;;  %p608_p10 = scmp.lt.u32.totalorder %s599_s4, %s859_s16 }
  0x39   : > { %p607_p4 = por %p606_p6, %p605_p3 }
  0x3a   : > { %p603_p13 = pneg %p602_p11 }
  0x3b   : > { %p609_p12 = por %p608_p10, %p607_p4 }
  0x3d   : > { %p610_p1 = pnand %p609_p12, %p603_p13 }
  0x3f   : > { %613 = shalt.err (!%p610_p1)
}
  0x40   : > { %s614_s25 = scalar_lea.vmem %s171_s19, 32  ;;  %s718_s3 = smov [#allocation5]  }
  0x41   : > { %p615_p2 = scmp.ne.s32.totalorder %s171_s19, %s614_s25  ;;  %s619_s7 = sshll.u32 %s718_s3, 4  ;;  %s620_s7 = int_to_ptr.vmem [resolvable:$false] %s619_s7 }
  0x42   : > { %s621_s8 = scalar_lea.vmem %s620_s7, 64  ;;  %p622_p8 = scmp.lt.s32.totalorder %s171_s19, %s620_s7 }
  0x43   : > { %p617_p9 = pnand %p615_p2, %p571_p5  ;;  %p623_p7 = scmp.lt.s32.totalorder %s621_s8, %s614_s25 }
  0x45   : > { %p618_p11 = pneg %p617_p9  ;;  %p624_p3 = por %p623_p7, %p622_p8 }
  0x47   : > { %p625_p6 = pnand %p624_p3, %p618_p11 }
  0x49   : > { %628 = shalt.err (!%p625_p6)
}
  0x4a   : > { %506 = dma.hbm_to_vmem [thread:$0]  (!%p814_p0), %s859_s16, 32, %s171_s19, %s157_s30  }
  0x4b   : > { %p981_p13 = scmp.ne.s32.totalorder %s980_s29, 0 }
  0x4c   : > { %s884_s15 = sand.u32 (!%p981_p13), 1, %s699_s10   ;;  %p982_p8 = scmp.ne.s32.totalorder (!%p981_p13), %s974_s21, 0 }
  0x4d   : > { %179 = sbr.rel (%p981_p13) target bundleno = 386 (0x182), region = 28  ;;  %s483_s18 = sshll.u32 (!%p981_p13), %s884_s15, 3 }
  0x4e   : > { %s182_s4 = scalar_lea.sflag (!%p981_p13), [#allocation3], %s884_s15  ;;  %s185_s6 = scalar_lea.vmem (!%p981_p13), [#allocation2], %s483_s18 }
  0x54   : > { %682 = dma.done.wait (%p982_p8), %s182_s4, 128  }
  0x55   : > { %684 = vsyncadd (%p982_p8), %s182_s4, 4294967168  ;;  %s484_s5 = sshll.u32 %s884_s15, 1  ;;  %s191_s29 = scalar_lea.sflag [#allocation6], %s884_s15 }
  0x56   : > { %s194_s16 = scalar_lea.vmem [#allocation5], %s484_s5 }
  0x57   : > { %686 = dma.done.wait (%p982_p8), %s191_s29, 32  }
  0x58   : > { %688 = vsyncadd (%p982_p8), %s191_s29, 4294967264  ;;  %vm227_vm0 = vcmask 1043456   ;;  %v222_v0 = vld [vmem:[%s185_s6] sm:$0xff]  ;;  %v272_v15 = vlaneseq  ;;  %v223_v22 = vld [vmem:[%s194_s16] sm:$0x3]  ;;  %vm334_vm4 = vcmask 1040384  }
  0x59   : > { %v225_v1 = vcombine.high %v222_v0, %v222_v0  ;;  %v228_v2 = vsel %vm227_vm0, %v222_v0, -inf  ;;  %v719_v56 = vmov 1966171168   ;;  %vm300_vm3 = vcmp.ne.s32.totalorder %v223_v22, 255  ;;  %s219_s21 = scalar_lea.vmem [#allocation7], %s483_s18  ;;  %s487_s30 = sshll.u32 %s707_s12, 7 }
  0x5a   : > { %v229_v3 = vrot.slane %v228_v2, 4  ;;  %v902_v18 = vshrl.u32 %v272_v15, 7  ;;  %v307_v57 = vunpack.c.l.s4 %v719_v56  ;;  %s364_s19 = sshll.u32 %s219_s21, 4  ;;  %s921_s28 = scalar_lea.hbm %s970_s2, %s487_s30  ;;  %s916_s19 = int_to_ptr.vmem [resolvable:$true] %s364_s19 }
  0x5b   : > { %v235_v4 = vsel %vm227_vm0, %v225_v1, -inf  ;;  %s350_s25 = scalar_lea.sflag [#allocation4], %s884_s15  ;;  %s629_s3 = scalar_lea.vmem %s916_s19, 128 }
  0x5c   : > { %v230_v5 = vmax.f32 %v228_v2, %v229_v3  ;;  %v236_v6 = vrot.slane %v235_v4, 4  ;;  %v276_v21 = vsub.s32 0, %v902_v18  ;;  %v280_v23 = vsub.s32 1, %v902_v18  ;;  %p630_p0 = scmp.ne.s32.totalorder %s916_s19, %s629_s3  ;;  %p983_p5 = scmp.ne.s32.totalorder %s975_s22, 0 }
  0x5d   : > { %s720_s12 = smov [#allocation7]  }
  0x5e   : > { %v231_v7 = vrot.slane %v230_v5, 2  ;;  %v237_v8 = vmax.f32 %v235_v4, %v236_v6  ;;  %v277_v24 = vrot.slane %v223_v22, %v276_v21  ;;  %v281_v25 = vrot.slane %v223_v22, %v280_v23  ;;  %p631_p7 = pnand %p630_p0, %p983_p5  ;;  %s633_s7 = sshll.u32 %s720_s12, 4  ;;  %s634_s7 = int_to_ptr.vmem [resolvable:$false] %s633_s7 }
  0x5f   : > { %s635_s8 = scalar_lea.vmem %s634_s7, 256  ;;  %p636_p10 = scmp.lt.s32.totalorder %s916_s19, %s634_s7 }
  0x60   : > { %v232_v9 = vmax.f32 %v230_v5, %v231_v7  ;;  %v238_v10 = vrot.slane %v237_v8, 2  ;;  %vm282_vm1 = vcmp.eq.s32.totalorder %v902_v18, %v277_v24  ;;  %vm283_vm2 = vcmp.eq.s32.totalorder %v902_v18, %v281_v25  ;;  %p632_p4 = pneg %p631_p7  ;;  %p637_p12 = scmp.lt.s32.totalorder %s635_s8, %s629_s3 }
  0x61   : > { %v284_v26 = vsel %vm282_vm1, %v222_v0, 0.0  ;;  %v285_v30 = vsel %vm283_vm2, %v225_v1, 0.0  ;;  %v308_v1 = vunpack.c.0.s8 %v307_v57 }
  0x62   : > { %v233_v11 = vrot.slane %v232_v9, 1  ;;  %v239_v12 = vmax.f32 %v237_v8, %v238_v10  ;;  %v286_v32 = vsel %vm227_vm0, %v284_v26, 0.0  ;;  %v293_v36 = vsel %vm227_vm0, %v285_v30, 0.0  ;;  %p638_p1 = por %p637_p12, %p636_p10 }
  0x63   : > { %v287_v37 = vrot.slane %v286_v32, 4  ;;  %v294_v40 = vrot.slane %v293_v36, 4  ;;  %v311_v5 = vsub.s32 %v308_v1, %v902_v18 }
  0x64   : > { %v234_v13 = vmax.f32 %v232_v9, %v233_v11  ;;  %v240_v14 = vrot.slane %v239_v12, 1  ;;  %p639_p2 = pnand %p638_p1, %p632_p4 }
  0x65   : > { %v288_v43 = vadd.f32 %v287_v37, %v286_v32  ;;  %v295_v46 = vadd.f32 %v294_v40, %v293_v36 }
  0x66   : > { %v241_v16 = vmax.f32 %v239_v12, %v240_v14 }
  0x67   : > { %v289_v49 = vrot.slane %v288_v43, 2  ;;  %v296_v51 = vrot.slane %v295_v46, 2 }
  0x68   : > { %v244_v17 = vcombine.low %v234_v13, %v241_v16 }
  0x69   : > { %v290_v52 = vadd.f32 %v289_v49, %v288_v43  ;;  %v297_v53 = vadd.f32 %v296_v51, %v295_v46 }
  0x6a   : > { %v246_v19 = vsub.f32 %v222_v0, %v244_v17 }
  0x6b   : > { %v291_v54 = vrot.slane %v290_v52, 1  ;;  %v298_v55 = vrot.slane %v297_v53, 1 }
  0x6c   : > { %v247_v20 = vmul.f32 1.442695, %v246_v19 }
  0x6d   : > { %v292_v60 = vadd.f32 %v291_v54, %v290_v52  ;;  %v299_v0 = vadd.f32 %v298_v55, %v297_v53 }
  0x6e   : > { %563 = vpow2.f32 %v247_v20 }
  0x78   : > { %v564_v27 = vpop.eup %563 }
  0x79   : > { %v250_v28 = vcombine.high %v564_v27, %v564_v27  ;;  %v252_v29 = vsel %vm227_vm0, %v564_v27, 0.0 }
  0x7a   : > { %v253_v31 = vrot.slane %v252_v29, 4 }
  0x7b   : > { %v259_v33 = vsel %vm227_vm0, %v250_v28, 0.0 }
  0x7c   : > { %v254_v34 = vadd.f32 %v253_v31, %v252_v29  ;;  %v260_v35 = vrot.slane %v259_v33, 4 }
  0x7e   : > { %v255_v38 = vrot.slane %v254_v34, 2  ;;  %v261_v39 = vadd.f32 %v260_v35, %v259_v33 }
  0x80   : > { %v256_v41 = vadd.f32 %v255_v38, %v254_v34  ;;  %v262_v42 = vrot.slane %v261_v39, 2 }
  0x82   : > { %v257_v44 = vrot.slane %v256_v41, 1  ;;  %v263_v45 = vadd.f32 %v262_v42, %v261_v39 }
  0x84   : > { %v258_v47 = vadd.f32 %v257_v44, %v256_v41  ;;  %v264_v48 = vrot.slane %v263_v45, 1 }
  0x86   : > { %v265_v50 = vadd.f32 %v264_v48, %v263_v45  ;;  %565 = vlog2.f32 %v258_v47 }
  0x88   : > { %567 = vlog2.f32 %v265_v50 }
  0x90   : > { %v566_v58 = vpop.eup %565 }
  0x91   : > { %v267_v59 = vmul.f32 0.6931472, %v566_v58 }
  0x92   : > { %v568_v61 = vpop.eup %567 }
  0x93   : > { %v269_v62 = vmul.f32 0.6931472, %v568_v61  ;;  %v270_v63 = vadd.f32 %v267_v59, %v234_v13 }
  0x95   : > { %v271_v2 = vadd.f32 %v269_v62, %v241_v16  ;;  %v301_v3 = vsub.f32 %v270_v63, %v292_v60 }
  0x97   : > { %v302_v4 = vsub.f32 %v271_v2, %v299_v0 }
  0x99   : > { %v305_v6 = vcombine.low %v301_v3, %v302_v4 }
  0x9b   : > { %v312_v7 = vrot.slane %v305_v6, %v311_v5 }
  0x9d   : > { %v319_v8 = vrot.slane %v312_v7, %v311_v5 }
  0x9f   : > { %v321_v9 = vsel %vm300_vm3, %v319_v8, 0.0 }
  0xa0   : > { %v322_v10 = vmax.f32 %v321_v9, 0.0 }
  0xa2   : > { %v327_v11 = vrot.slane %v322_v10, %v276_v21  ;;  %v331_v12 = vrot.slane %v322_v10, %v280_v23 }
  0xa4   : > { %v335_v14 = vsel %vm334_vm4, %v327_v11, 0.0  ;;  %v336_v13 = vsel %vm334_vm4, %v331_v12, 0.0 }
  0xa5   : > { %v337_v15 = vadd.f32 %v336_v13, %v335_v14 }
  0xa7   : > { %338 = vadd.xlane.f32.xlu0 %v337_v15 }
 0x134   : > { %v339_v16 = vpop.xlane.xlu0 %338 }
 0x135   : > { %v340_v17 = vrot.slane %v339_v16, 4 }
 0x137   : > { %v341_v19 = vadd.f32 %v340_v17, %v339_v16 }
 0x139   : > { %v342_v18 = vrot.slane %v341_v19, 2 }
 0x13b   : > { %v343_v20 = vadd.f32 %v342_v18, %v341_v19 }
 0x13d   : > { %v344_v22 = vrot.slane %v343_v20, 1 }
 0x13f   : > { %v345_v24 = vadd.f32 %v344_v22, %v343_v20 }
 0x141   : > { %492 = vpush %v345_v24 }
 0x172   : > { %s493_s20 = spop %492 }
 0x173   : > { %v347_v21 = vstv %s493_s20 }
 0x174   : > { %348 = vst [vmem:[%s219_s21] sm:$0xff] %v347_v21 }
 0x175   : > { %642 = shalt.err (!%p639_p2)
}
 0x176   : > { %s643_s15 = scalar_lea.hbm %s921_s28, 128  ;;  %s647_s6 = scalar_lea.hbm %s970_s2, 256 }
 0x177   : > { %p644_p9 = scmp.ne.s32.totalorder %s921_s28, %s643_s15  ;;  %p648_p6 = scmp.lt.u32.totalorder %s921_s28, %s970_s2 }
 0x178   : > { %p649_p13 = scmp.lt.u32.totalorder %s647_s6, %s643_s15  ;;  %p651_p0 = scmp.lt.u32.totalorder %s643_s15, %s921_s28 }
 0x179   : > { %p645_p11 = pnand %p644_p9, %p983_p5 }
 0x17a   : > { %p650_p8 = por %p649_p13, %p648_p6 }
 0x17b   : > { %p646_p3 = pneg %p645_p11 }
 0x17c   : > { %p652_p7 = por %p651_p0, %p650_p8 }
 0x17e   : > { %p653_p4 = pnand %p652_p7, %p646_p3 }
 0x180   : > { %656 = shalt.err (!%p653_p4)
}
 0x181   : > { %498 = dma.vmem_to_hbm [thread:$0]  (%p983_p5), %s916_s19, 128, %s921_s28, %s350_s25  }
 0x182 PF: > { %s376_s16 = sand.u32 1, %s695_s9   ;;  %p984_p10 = scmp.ne.s32.totalorder %s976_s24, 0 }
 0x183   : > { %p985_p12 = scmp.ge.s32.totalorder %s715_s14, 2  ;;  %s377_s21 = scalar_lea.sflag [#allocation4], %s376_s16 }
 0x185   : > { %p508_p1 = pnand %p985_p12, %p984_p10 }
 0x187   : > { %690 = dma.done.wait (!%p508_p1), %s377_s21, 128  }
 0x188   : > { %692 = vsyncadd (!%p508_p1), %s377_s21, 4294967168  ;;  %s21_s14 = sadd.s32 1, %s715_s14   ;;  %s986_s9 = smov %s699_s10 }
 0x189   : > { %p18_p2 = scmp.ge.s32.totalorder %s21_s14, 4   ;;  %s987_s10 = smov %s703_s11 }
 0x18a   : > { %s988_s11 = smov %s792_s23  ;;  %s989_s12 = smov %s711_s13 }
 0x18b   : > { %s990_s13 = smov %s992_s17  ;;  %20 = sbr.rel (!%p18_p2) target bundleno = 8 (0x8), region = 86 }
 0x192   :  { %382 = vsyncpa [#allocation3], 1 }
 0x193   :  { %384 = vsyncpa [#allocation3 + $0x1], 1 }
 0x194   :  { %385 = vsyncpa [#allocation6], 1 }
 0x195   :  { %387 = vsyncpa [#allocation6 + $0x1], 1 }
 0x196   :  { %388 = vsyncpa [#allocation4], 1 }
 0x197   :  { %390 = vsyncpa [#allocation4 + $0x1], 1 }

</bundles_post_ra>
